<compile_context>
chip_gen: v6e
topology: v6e:2x2x1
jax: 0.10.0
libtpu: 0.0.40
codegen_flags: <defaults>
</compile_context>

<pallas_src>
import math

import jax
import jax.numpy as jnp
from jax import lax
from jax.experimental import pallas as pl
from jax.experimental.pallas import tpu as pltpu

ALPHAS = (0.05,)                      # Score.alphas
W = 10.0                              # default W of S_quant / G1_quant
_SMALL_ELEMENTS = 1 << 16             # below this, fused XLA beats kernel launch overhead
_TARGET_TILE_BYTES = 4 * 1024 * 1024  # per PNL input buffer (x2 for double buffering)
_NUM_CORE_SPLITS = 2                  # per-split partial accumulators; maps to 2 TCs on v7x


def _fold_factor(b):
    """Lane-densification factor k: fold k rows of width B into one row of width k*B.

    Chosen so k*B is a multiple of 128 (full lane utilisation).  Skipped when B is already
    a multiple of 128 or large enough that lane padding waste is negligible (<~6%).
    """
    if b % 128 == 0 or b > 2048:
        return 1
    return 128 // math.gcd(b, 128)


def _choose_tile_rows(r, bd):
    """Rows per streamed tile of the densified (r, bd) view; capped by bytes only."""
    row_bytes = 4 * (((bd + 127) // 128) * 128)   # lane-padded VMEM row bytes
    tm = _TARGET_TILE_BYTES // row_bytes
    tm = max(8, (tm // 8) * 8)
    return r if tm >= r else tm


def _make_score_quant_kernel(r_total, tm, num_tiles, tiles_per_split, c1, c0,
                             need_row_mask, has_idle_tile):
    """Kernel summing the X-dependent part of S_quant over a lane-densified (r, bd) array."""

    def kernel(cols_ref, x_ref, out_ref):
        # cols_ref: (3, bd) lane-dense slab: row0 = v, row1 = c1*v + e, row2 = c0*v.
        # x_ref:    (tm, bd) streamed tile of the densified PNL view.
        # out_ref:  (8, bd) f32 partial accumulator, resident across the inner (arbitrary) axis.
        c = pl.program_id(0)          # core-split index ("parallel")
        i = pl.program_id(1)          # tile index within the split ("arbitrary")
        t = c * tiles_per_split + i   # absolute tile index

        @pl.when(i == 0)
        def _init():
            out_ref[...] = jnp.zeros_like(out_ref)

        def accumulate(mask_rows):
            v = cols_ref[0:1, :]      # (1, bd), broadcast down the sublane axis
            p1 = cols_ref[1:2, :]     # c1*v + e
            p0 = cols_ref[2:3, :]     # c0*v
            x = x_ref[...]            # (tm, bd)

            pred = x <= v
            cfac = jnp.where(pred, c1, c0)     # branch coefficient (compile-time constants)
            poff = jnp.where(pred, p1, p0)     # per-column offset
            dep = (v - x) * (cfac * x + poff)  # ~7 VALU ops / element

            if mask_rows:
                # Only the genuinely-last tile of the densified view runs this path.
                row = t * tm + lax.broadcasted_iota(jnp.int32, dep.shape, 0)
                dep = jnp.where(row < r_total, dep, 0.0)

            # Sublane-only reduce (cheap: ~1/8 VALU add/element + tiny XLU), accumulated into
            # a lane-dense row of the resident block.  Final cross-lane reduce is in the wrapper.
            out_ref[0:1, :] += jnp.sum(dep, axis=0, keepdims=True)

        def body():
            if need_row_mask:
                @pl.when(t == num_tiles - 1)
                def _last():
                    accumulate(True)

                @pl.when(t != num_tiles - 1)
                def _bulk():
                    accumulate(False)
            else:
                accumulate(False)

        if has_idle_tile:
            # Odd tile count on the 2-way split: the clamped duplicate tile is skipped.
            @pl.when(t < num_tiles)
            def _valid():
                body()
        else:
            body()

    return kernel


def _score_quant_sum_pallas(cols, x, c1, c0, tile_rows=None):
    """Sum over all elements of the X-dependent part of S_quant (densified layout)."""
    r, bd = x.shape
    if tile_rows is None:
        tm = _choose_tile_rows(r, bd)
    else:
        tm = max(8, (int(tile_rows) // 8) * 8)
        tm = min(tm, r)                      # full-dim block is always legal

    num_tiles = pl.cdiv(r, tm)
    nc = _NUM_CORE_SPLITS if num_tiles > 1 else 1
    tiles_per_split = pl.cdiv(num_tiles, nc)
    has_idle_tile = (nc * tiles_per_split) != num_tiles
    need_row_mask = (r % tm) != 0

    kernel = _make_score_quant_kernel(r, tm, num_tiles, tiles_per_split,
                                      float(c1), float(c0),
                                      need_row_mask, has_idle_tile)

    if has_idle_tile:
        def x_index(c, i):
            # Clamp so the (gated-off) idle assignment never issues an out-of-range DMA.
            return (jnp.minimum(c * tiles_per_split + i, num_tiles - 1), 0)
    else:
        def x_index(c, i):
            return (c * tiles_per_split + i, 0)

    out = pl.pallas_call(
        kernel,
        out_shape=jax.ShapeDtypeStruct((nc * 8, bd), jnp.float32),
        grid=(nc, tiles_per_split),
        in_specs=[
            pl.BlockSpec((3, bd), lambda c, i: (0, 0)),   # v / p1 / p0 slab (resident)
            pl.BlockSpec((tm, bd), x_index),              # streamed densified PNL tiles
        ],
        out_specs=pl.BlockSpec((8, bd), lambda c, i: (c, 0)),  # per-split partial accumulator
        compiler_params=pltpu.CompilerParams(
            dimension_semantics=("parallel", "arbitrary"),
        ),
        cost_estimate=pl.CostEstimate(
            flops=8 * r * bd,
            transcendentals=0,
            bytes_accessed=4 * (r * bd + 3 * bd + nc * 8 * bd),
        ),
    )(cols, x)
    return jnp.sum(out, dtype=jnp.float32)


def _score_forward_ref(PNL_validity, PNL):
    """Pure-JAX reference mirroring the PyTorch code path (alpha < 0.5 branch)."""
    loss = jnp.float32(0.0)
    for i, alpha in enumerate(ALPHAS):
        v = PNL_validity[:, 2 * i:2 * i + 1]        # (B, 1)
        e = PNL_validity[:, 2 * i + 1:2 * i + 2]    # (B, 1)
        X = PNL.T                                   # (B, M)
        ind = (X <= v).astype(jnp.float32)
        rt = ((ind - alpha) * (-W * v ** 2 / 2 - (-W * X ** 2 / 2))
              + (1.0 / alpha) * (alpha * e) * ind * (v - X)
              + (alpha * e) * (e - v)
              - alpha * e ** 2 / 2)
        loss = loss + jnp.mean(rt)
    return loss


def score_forward(PNL_validity, PNL, *, force_kernel=False, tile_rows=None):
    """Replicates Score().forward(PNL_validity, PNL) for alphas=[0.05], score_name='quant'.

    PNL_validity: (B, 2*len(alphas)) -- columns [2i, 2i+1] = (VaR, ES) for alpha i.
    PNL:          (M, B)             -- consumed in native layout (the torch code transposes).
    tile_rows:    optional row-tile override, in rows of the lane-densified (M/k, k*B) view.
    """
    PNL_validity = PNL_validity.astype(jnp.float32)
    PNL = PNL.astype(jnp.float32)
    M, B = PNL.shape

    if not force_kernel and M * B < _SMALL_ELEMENTS:
        # Launch + per-grid-step overhead dominates tiny workloads; use the fused XLA path.
        return _score_forward_ref(PNL_validity, PNL)

    loss = jnp.float32(0.0)
    for i, alpha in enumerate(ALPHAS):
        assert alpha < 0.5  # TODO(synk): alpha >= 0.5 branch not implemented (unused by module)
        v = PNL_validity[:, 2 * i]          # (B,)
        e = PNL_validity[:, 2 * i + 1]      # (B,)

        c1 = -(1.0 - alpha) * W * 0.5       # coefficient when X <= v
        c0 = alpha * W * 0.5                # coefficient when X >  v

        k = _fold_factor(B)
        pad = (-M) % k
        if pad:
            # Pad with X == v rows: their X-dependent S_quant term is exactly 0.
            # (Only path that materialises a copy of PNL; taken when M % k != 0.)
            x = jnp.concatenate(
                [PNL, jnp.broadcast_to(v[None, :], (pad, B))], axis=0)
        else:
            x = PNL
        r = (M + pad) // k
        xd = x.reshape(r, k * B)            # free: row-major contiguous, same HBM bytes

        cols = jnp.stack([v, c1 * v + e, c0 * v], axis=0)   # (3, B)
        if k > 1:
            cols = jnp.tile(cols, (1, k))                    # (3, k*B): col c -> column c % B

        dep_sum = _score_quant_sum_pallas(cols, xd, c1, c0, tile_rows=tile_rows)
        dep_mean = dep_sum / jnp.float32(M * B)
        # X-independent part of S_quant: alpha*e*(e - v) - alpha*e^2/2 = alpha*e*(e/2 - v).
        # Constant along M, so its (B, M) mean equals its mean over B -- reduce once here.
        const_mean = jnp.mean(alpha * e * (0.5 * e - v))
        loss = loss + dep_mean + const_mean
    return loss


if __name__ == "__main__":
    key = jax.random.PRNGKey(0)
    k1, k2, k3, k4, k5, k6 = jax.random.split(key, 6)

    # Case 1: tiny shapes matching the module layout ([:,0]=VaR, [:,1]=ES; PNL is (M, B)).
    B1, M1 = 8, 16
    pv1 = jax.random.normal(k1, (B1, 2), dtype=jnp.float32)
    pnl1 = jax.random.normal(k2, (M1, B1), dtype=jnp.float32)
    out1 = score_forward(pv1, pnl1, force_kernel=True)
    jax.block_until_ready(out1)
    ref1 = _score_forward_ref(pv1, pnl1)
    assert jnp.allclose(out1, ref1, rtol=1e-4, atol=1e-5), (out1, ref1)

    # Case 2: multi-tile grid, 2-way split, last-tile row masking (densified R=25, tm=8).
    B2, M2 = 16, 200
    pv2 = jax.random.normal(k3, (B2, 2), dtype=jnp.float32)
    pnl2 = jax.random.normal(k4, (M2, B2), dtype=jnp.float32)
    out2 = score_forward(pv2, pnl2, force_kernel=True, tile_rows=8)
    jax.block_until_ready(out2)
    ref2 = _score_forward_ref(pv2, pnl2)
    assert jnp.allclose(out2, ref2, rtol=1e-4, atol=1e-5), (out2, ref2)

    # Case 3: M % k != 0 (v-padding path) + odd tile count (idle-tile gate on the 2-way split).
    B3, M3 = 8, 310
    pv3 = jax.random.normal(k5, (B3, 2), dtype=jnp.float32)
    pnl3 = jax.random.normal(k6, (M3, B3), dtype=jnp.float32)
    out3 = score_forward(pv3, pnl3, force_kernel=True, tile_rows=8)
    jax.block_until_ready(out3)
    ref3 = _score_forward_ref(pv3, pnl3)
    assert jnp.allclose(out3, ref3, rtol=1e-4, atol=1e-5), (out3, ref3)

    print("KERNEL_OK")
</pallas_src>

<mosaic_0001>
module attributes {stable_mosaic.version = 11 : i64} {
  func.func @kernel(%arg0: i32, %arg1: i32, %arg2: memref<3x128xf32, #tpu.memory_space<vmem>>, %arg3: memref<1x128xf32, #tpu.memory_space<vmem>>, %arg4: memref<8x128xf32, #tpu.memory_space<vmem>>) attributes {dimension_semantics = [#tpu.dimension_semantics<parallel>, #tpu.dimension_semantics<arbitrary>], iteration_bounds = array<i64: 1, 1>, scalar_prefetch = 0 : i64, scratch_operands = 0 : i64, tpu.core_type = #tpu.core_type<tc>, window_params = [{pipeline_mode = #tpu.pipeline_mode<synchronous>, transform_indices = @transform_0, window_bounds = array<i64: 3, 128>}, {transform_indices = @transform_1, window_bounds = array<i64: 1, 128>}, {transform_indices = @transform_2, window_bounds = array<i64: 8, 128>}]} {
    %c0_i32 = arith.constant 0 : i32
    %0 = arith.cmpi eq, %arg1, %c0_i32 : i32
    %1 = arith.extui %0 : i1 to i32
    %c0_i32_0 = arith.constant 0 : i32
    %2 = arith.cmpi ne, %1, %c0_i32_0 : i32
    scf.if %2 {
      %cst_12 = arith.constant 0.000000e+00 : f32
      %21 = vector.broadcast %cst_12 : f32 to vector<8x128xf32>
      %c0_13 = arith.constant 0 : index
      %c0_14 = arith.constant 0 : index
      %22 = vector.load %arg4[%c0_13, %c0_14] : memref<8x128xf32, #tpu.memory_space<vmem>>, vector<8x128xf32>
      tpu.vector_store %arg4[%c0_13, %c0_14], %21 {strides = array<i32>} : memref<8x128xf32, #tpu.memory_space<vmem>>, vector<8x128xf32>,
    } else {
    }
    %c0 = arith.constant 0 : index
    %c0_1 = arith.constant 0 : index
    %3 = vector.load %arg2[%c0, %c0_1] : memref<3x128xf32, #tpu.memory_space<vmem>>, vector<1x128xf32>
    %c1 = arith.constant 1 : index
    %c0_2 = arith.constant 0 : index
    %4 = vector.load %arg2[%c1, %c0_2] : memref<3x128xf32, #tpu.memory_space<vmem>>, vector<1x128xf32>
    %c2 = arith.constant 2 : index
    %c0_3 = arith.constant 0 : index
    %5 = vector.load %arg2[%c2, %c0_3] : memref<3x128xf32, #tpu.memory_space<vmem>>, vector<1x128xf32>
    %c0_4 = arith.constant 0 : index
    %c0_5 = arith.constant 0 : index
    %6 = vector.load %arg3[%c0_4, %c0_5] : memref<1x128xf32, #tpu.memory_space<vmem>>, vector<1x128xf32>
    %7 = arith.cmpf ole, %6, %3 : vector<1x128xf32>
    %cst = arith.constant -4.750000e+00 : f32
    %cst_6 = arith.constant 2.500000e-01 : f32
    %8 = vector.broadcast %cst : f32 to vector<1x128xf32>
    %9 = vector.broadcast %cst_6 : f32 to vector<1x128xf32>
    %10 = arith.select %7, %8, %9 : vector<1x128xi1>, vector<1x128xf32>
    %11 = arith.select %7, %4, %5 : vector<1x128xi1>, vector<1x128xf32>
    %12 = arith.subf %3, %6 : vector<1x128xf32>
    %13 = arith.mulf %10, %6 : vector<1x128xf32>
    %14 = arith.addf %13, %11 : vector<1x128xf32>
    %15 = arith.mulf %12, %14 : vector<1x128xf32>
    %c0_7 = arith.constant 0 : index
    %c0_8 = arith.constant 0 : index
    %16 = vector.load %arg4[%c0_7, %c0_8] : memref<8x128xf32, #tpu.memory_space<vmem>>, vector<1x128xf32>
    %cst_9 = arith.constant dense<0.000000e+00> : vector<128xf32>
    %17 = vector.multi_reduction <add>, %15, %cst_9 [0] : vector<1x128xf32> to vector<128xf32>
    %18 = vector.shape_cast %17 : vector<128xf32> to vector<1x128xf32>
    %19 = arith.addf %16, %18 : vector<1x128xf32>
    %c0_10 = arith.constant 0 : index
    %c0_11 = arith.constant 0 : index
    %20 = vector.load %arg4[%c0_10, %c0_11] : memref<8x128xf32, #tpu.memory_space<vmem>>, vector<1x128xf32>
    tpu.vector_store %arg4[%c0_10, %c0_11], %19 {strides = array<i32>} : memref<8x128xf32, #tpu.memory_space<vmem>>, vector<1x128xf32>,
    return
  }
  func.func @transform_0(%arg0: i32, %arg1: i32) -> (i32, i32) {
    %c0_i32 = arith.constant 0 : i32
    %c0_i32_0 = arith.constant 0 : i32
    %c0_i32_1 = arith.constant 0 : i32
    return %c0_i32, %c0_i32_0 : i32, i32
  }
  func.func @transform_1(%arg0: i32, %arg1: i32) -> (i32, i32) {
    %c1_i32 = arith.constant 1 : i32
    %0 = arith.muli %arg0, %c1_i32 : i32
    %1 = arith.addi %0, %arg1 : i32
    %c0_i32 = arith.constant 0 : i32
    %c0_i32_0 = arith.constant 0 : i32
    return %1, %c0_i32 : i32, i32
  }
  func.func @transform_2(%arg0: i32, %arg1: i32) -> (i32, i32) {
    %c0_i32 = arith.constant 0 : i32
    %c0_i32_0 = arith.constant 0 : i32
    return %arg0, %c0_i32 : i32, i32
  }
}

</mosaic_0001>

<bundles_post_ra>
// kernel: tpu_custom_call.1
= control target key start
LH: loop header
LB: loop body
LE: loop exit
PB: predicated region body
PF: predicated region fallthrough
CT: control target
= control target key end

     0   :  { %7 = vsyncpa [#allocation3], 0  ;;  %s152_s0 = inlined_call_operand.hbm [shape: f32[3,128], index: 0, kind: input, shape index: {}]   ;;  %s153_s1 = inlined_call_operand.vmem [shape: f32[1,128], index: 1, kind: input, shape index: {}]   ;;  %s154_s2 = inlined_call_operand.hbm [shape: f32[8,128], index: 2, kind: output, shape index: {}]  }
   0x1   :  { %8 = vsyncpa [#allocation4], 0  ;;  %s124_s9 = smov [#allocation2]  }
   0x2   :  { %s15_s10 = sshll.u32 %s124_s9, 4  ;;  %s16_s10 = int_to_ptr.vmem [resolvable:$true] %s15_s10 }
   0x3   :  { %s88_s11 = scalar_lea.vmem %s16_s10, 64  ;;  %p93_p1 = scmp.lt.s32.totalorder %s16_s10, %s16_s10 }
   0x4   :  { %p89_p0 = scmp.ne.s32.totalorder %s16_s10, %s88_s11  ;;  %p94_p2 = scmp.lt.s32.totalorder %s88_s11, %s88_s11 }
   0x6   :  { %p95_p3 = por %p94_p2, %p93_p1 }
   0x8   :  { %p96_p4 = pnand %p95_p3, %p89_p0 }
   0xa   :  { %99 = shalt.err (!%p96_p4)
}
   0xb   :  { %18 = dma.hbm_to_vmem [thread:$0]  %s152_s0, 64, %s16_s10, [#allocation3]  }
   0xc   :  { %120 = dma.done.wait [#allocation3], 64  }
   0xd   :  { %121 = vsyncadd [#allocation3], 4294967232  ;;  %v125_v0 = vmov 0.0   ;;  %v43_v1 = vld [vmem:[#allocation2] sm:$0x1]  ;;  %v126_v5 = vmov 0.25  }
   0xe   :  { %42 = vst [vmem:[#allocation5] sm:$0xff] %v125_v0  ;;  %v44_v2 = vld [vmem:[#allocation2 + $0x1] sm:$0x1]  ;;  %v45_v3 = vld [vmem:[#allocation2 + $0x2] sm:$0x1]  ;;  %s127_s0 = smov [#allocation5]  }
   0xf   :  { %v46_v4 = vld [vmem:[%s153_s1] sm:$0x1]  ;;  %s64_s16 = sshll.u32 %s127_s0, 4  ;;  %s65_s16 = int_to_ptr.vmem [resolvable:$true] %s64_s16 }
  0x10   :  { %vm47_vm0 = vcmp.le.f32.partialorder %v46_v4, %v43_v1  ;;  %v50_v8 = vsub.f32 %v43_v1, %v46_v4  ;;  %s100_s17 = scalar_lea.vmem %s65_s16, 128  ;;  %p105_p6 = scmp.lt.s32.totalorder %s65_s16, %s65_s16 }
  0x11   :  { %v48_v6 = vsel %vm47_vm0, -4.75, %v126_v5  ;;  %v49_v7 = vsel %vm47_vm0, %v44_v2, %v45_v3  ;;  %p101_p5 = scmp.ne.s32.totalorder %s65_s16, %s100_s17  ;;  %p106_p7 = scmp.lt.s32.totalorder %s100_s17, %s100_s17 }
  0x12   :  { %v51_v9 = vmul.f32 %v48_v6, %v46_v4 }
  0x13   :  { %p107_p8 = por %p106_p7, %p105_p6 }
  0x14   :  { %v52_v10 = vadd.f32 %v51_v9, %v49_v7 }
  0x15   :  { %v54_v11 = vld [vmem:[#allocation5] sm:$0x1]  ;;  %p108_p9 = pnand %p107_p8, %p101_p5 }
  0x16   :  { %v53_v12 = vmul.f32 %v52_v10, %v50_v8 }
  0x18   :  { %v56_v13 = vadd.f32 %v54_v11, %v53_v12 }
  0x1a   :  { %57 = vst [vmem:[#allocation5] sm:$0x1] %v56_v13 }
  0x1b   :  { %111 = shalt.err (!%p108_p9)
}
  0x1c   :  { %67 = dma.vmem_to_hbm [thread:$0]  %s65_s16, 128, %s154_s2, [#allocation4]  }
  0x1d   :  { %122 = dma.done.wait [#allocation4], 128  }
  0x1e   :  { %123 = vsyncadd [#allocation4], 4294967168 }
  0x1f   :  { %71 = vsyncpa [#allocation3], 1 }
  0x20   :  { %72 = vsyncpa [#allocation4], 1 }

</bundles_post_ra>
